<compile_context>
chip_gen: v6e
topology: v6e:2x2x1
jax: 0.10.0
libtpu: 0.0.40
codegen_flags: <defaults>
</compile_context>

<pallas_src>
import jax
import jax.numpy as jnp
from jax.experimental import pallas as pl
from jax.experimental.pallas import tpu as pltpu

LANE = 128
SUBLANE = 8


def _round_up(x, m):
    return (x + m - 1) // m * m


def _pick_batch_tile(batch):
    """Batch tile: multiple of 8 sublanes, large for v5e/v6e, halved for 64MiB-VMEM parts."""
    tb = min(1024, _round_up(max(batch, SUBLANE), SUBLANE))
    try:
        # v7x has 64 MiB VMEM per TensorCore (vs 128 MiB on v5e/v6e) -> smaller tile.
        if pltpu.get_tpu_info().vmem_capacity_bytes <= 64 * 1024 * 1024:
            tb = min(tb, 512)
    except Exception:
        pass
    return tb


def _mlp_kernel(uid_ref, iid_ref, p_ref, q_ref, *param_and_out_refs):
    """Fused: embedding gather + split first layer + (Linear -> ReLU) chain.

    param_and_out_refs = (w0a, w0b, b0, w1, b1, ..., out_ref)
    All weight tiles are pre-transposed (in, out) and zero-padded to 128-lane widths.
    """
    out_ref = param_and_out_refs[-1]
    params = param_and_out_refs[:-1]

    uid = uid_ref[...]                       # (TB, 1) int32
    iid = iid_ref[...]                       # (TB, 1) int32
    tb = uid.shape[0]
    nu = p_ref.shape[0]                      # padded table rows (multiple of 128)
    ni = q_ref.shape[0]

    # In-kernel embedding gather as exact one-hot matmuls (runs on the MXU).
    onehot_u = (jax.lax.broadcasted_iota(jnp.int32, (tb, nu), 1) == uid).astype(jnp.float32)
    onehot_i = (jax.lax.broadcasted_iota(jnp.int32, (tb, ni), 1) == iid).astype(jnp.float32)
    pu = jnp.dot(onehot_u, p_ref[...], preferred_element_type=jnp.float32)   # (TB, kp)
    qi = jnp.dot(onehot_i, q_ref[...], preferred_element_type=jnp.float32)   # (TB, kp)

    # Layer 0: concat([pu, qi]) @ W0.T + b0  ==  pu @ W0a + qi @ W0b + b0
    # (split weight along its input dim: no lane-axis concat / XLU relayout).
    w0a = params[0][...]
    w0b = params[1][...]
    b0 = params[2][...]
    x = jnp.dot(pu, w0a, preferred_element_type=jnp.float32)
    x = x + jnp.dot(qi, w0b, preferred_element_type=jnp.float32)
    x = jnp.maximum(x + b0, 0.0)

    # Remaining layers: lane-dense (zero-padded) matmul + bias + ReLU.
    for idx in range(3, len(params), 2):
        w = params[idx][...]
        b = params[idx + 1][...]
        x = jnp.maximum(jnp.dot(x, w, preferred_element_type=jnp.float32) + b, 0.0)

    out_ref[...] = x.astype(out_ref.dtype)


def mlp_forward(P, Q, user_ids, item_ids, weights, biases, *, batch_tile=None):
    """Single fused pallas_call for the whole forward pass.

    P: (n_users, k), Q: (n_items, k) embedding tables.
    user_ids/item_ids: (B,) integer ids.
    weights: list of torch-layout (out, in) matrices; biases: list of (out,) vectors.
    Returns (B, layer_sizes[-1]) float32.
    """
    B = int(user_ids.shape[0])
    n_users, k = P.shape
    n_items, _ = Q.shape
    out_dim = weights[-1].shape[0]

    kp = _round_up(k, LANE)
    nu_p = _round_up(n_users, LANE)          # lane-dense one-hot contraction
    ni_p = _round_up(n_items, LANE)

    TB = batch_tile if batch_tile is not None else _pick_batch_tile(B)
    TB = _round_up(TB, SUBLANE)
    B_pad = _round_up(B, TB)
    grid = (B_pad // TB,)

    f32 = jnp.float32

    # Zero-padded embedding tables (extra rows/cols are zero -> inert).
    P_pad = jnp.zeros((nu_p, kp), f32).at[:n_users, :k].set(jnp.asarray(P, f32))
    Q_pad = jnp.zeros((ni_p, kp), f32).at[:n_items, :k].set(jnp.asarray(Q, f32))

    # Ids as (B_pad, 1) int32; padded rows point at row 0 and are sliced off at the end.
    uid = jnp.zeros((B_pad, 1), jnp.int32).at[:B, 0].set(jnp.asarray(user_ids, jnp.int32))
    iid = jnp.zeros((B_pad, 1), jnp.int32).at[:B, 0].set(jnp.asarray(item_ids, jnp.int32))

    # Layer params: pre-transposed (in, out), zero-padded to 128-lane tiles.
    params = []
    w0 = jnp.asarray(weights[0], f32)                      # (h0, 2k)
    b0 = jnp.asarray(biases[0], f32)
    h0 = w0.shape[0]
    h0p = _round_up(h0, LANE)
    params.append(jnp.zeros((kp, h0p), f32).at[:k, :h0].set(w0[:, :k].T))   # W0a
    params.append(jnp.zeros((kp, h0p), f32).at[:k, :h0].set(w0[:, k:].T))   # W0b
    params.append(jnp.zeros((1, h0p), f32).at[0, :h0].set(b0))

    prev, prev_p = h0, h0p
    for w, b in zip(weights[1:], biases[1:]):
        w = jnp.asarray(w, f32)                            # (h, prev)
        b = jnp.asarray(b, f32)
        h = w.shape[0]
        hp = _round_up(h, LANE)
        params.append(jnp.zeros((prev_p, hp), f32).at[:prev, :h].set(w.T))
        params.append(jnp.zeros((1, hp), f32).at[0, :h].set(b))
        prev, prev_p = h, hp
    out_p = prev_p

    # BlockSpecs: batch-tiled ids/output, VMEM-resident tables/weights/biases.
    id_spec = pl.BlockSpec((TB, 1), lambda i: (i, 0))

    def resident(shape):
        return pl.BlockSpec(shape, lambda i: (0, 0))

    in_specs = [id_spec, id_spec, resident(P_pad.shape), resident(Q_pad.shape)]
    in_specs += [resident(p.shape) for p in params]
    out_spec = pl.BlockSpec((TB, out_p), lambda i: (i, 0))

    out = pl.pallas_call(
        _mlp_kernel,
        out_shape=jax.ShapeDtypeStruct((B_pad, out_p), f32),
        grid=grid,
        in_specs=in_specs,
        out_specs=out_spec,
        compiler_params=pltpu.CompilerParams(
            dimension_semantics=("parallel",),
            vmem_limit_bytes=64 * 1024 * 1024,
        ),
    )(uid, iid, P_pad, Q_pad, *params)

    return out[:B, :out_dim]


def mlp_reference(P, Q, user_ids, item_ids, weights, biases):
    x = jnp.concatenate([P[user_ids], Q[item_ids]], axis=1)
    for w, b in zip(weights, biases):
        x = jnp.maximum(x @ w.T + b, 0.0)
    return x


if __name__ == "__main__":
    # Small, deterministic setup consistent with the module's __init__.
    n_users, n_items, k = 32, 32, 16
    layer_sizes = (32, 16, 8)
    batch = 8

    key = jax.random.PRNGKey(0)
    kP, kQ, ku, ki, *kws = jax.random.split(key, 4 + 2 * len(layer_sizes))

    # nn.init.normal_(std=0.01) on embedding tables and layer weights.
    P = 0.01 * jax.random.normal(kP, (n_users, k), dtype=jnp.float32)
    Q = 0.01 * jax.random.normal(kQ, (n_items, k), dtype=jnp.float32)

    weights, biases = [], []
    prev = 2 * k
    for idx, size in enumerate(layer_sizes):
        wkey = kws[2 * idx]
        bkey = kws[2 * idx + 1]
        weights.append(0.01 * jax.random.normal(wkey, (size, prev), dtype=jnp.float32))
        # torch Linear bias default init is uniform(-1/sqrt(in), 1/sqrt(in)).
        bound = 1.0 / jnp.sqrt(prev)
        biases.append(jax.random.uniform(bkey, (size,), jnp.float32, -bound, bound))
        prev = size

    user_ids = jax.random.randint(ku, (batch,), 0, n_users)
    item_ids = jax.random.randint(ki, (batch,), 0, n_items)

    out = mlp_forward(P, Q, user_ids, item_ids, weights, biases)
    out = jax.block_until_ready(out)

    ref = mlp_reference(P, Q, user_ids, item_ids, weights, biases)
    assert out.shape == (batch, layer_sizes[-1])
    assert jnp.allclose(out, ref, atol=2e-5, rtol=1e-4), "mismatch vs reference"

    print("KERNEL_OK")
</pallas_src>

<mosaic_0001>
module attributes {stable_mosaic.version = 11 : i64} {
  func.func @_mlp_kernel(%arg0: i32, %arg1: memref<8x1xi32, #tpu.memory_space<vmem>>, %arg2: memref<8x1xi32, #tpu.memory_space<vmem>>, %arg3: memref<128x128xf32, #tpu.memory_space<vmem>>, %arg4: memref<128x128xf32, #tpu.memory_space<vmem>>, %arg5: memref<128x128xf32, #tpu.memory_space<vmem>>, %arg6: memref<128x128xf32, #tpu.memory_space<vmem>>, %arg7: memref<1x128xf32, #tpu.memory_space<vmem>>, %arg8: memref<128x128xf32, #tpu.memory_space<vmem>>, %arg9: memref<1x128xf32, #tpu.memory_space<vmem>>, %arg10: memref<128x128xf32, #tpu.memory_space<vmem>>, %arg11: memref<1x128xf32, #tpu.memory_space<vmem>>, %arg12: memref<8x128xf32, #tpu.memory_space<vmem>>) attributes {dimension_semantics = [#tpu.dimension_semantics<parallel>], iteration_bounds = array<i64: 1>, scalar_prefetch = 0 : i64, scratch_operands = 0 : i64, tpu.core_type = #tpu.core_type<tc>, window_params = [{transform_indices = @transform_0, window_bounds = array<i64: 8, 1>}, {transform_indices = @transform_1, window_bounds = array<i64: 8, 1>}, {pipeline_mode = #tpu.pipeline_mode<synchronous>, transform_indices = @transform_2, window_bounds = array<i64: 128, 128>}, {pipeline_mode = #tpu.pipeline_mode<synchronous>, transform_indices = @transform_3, window_bounds = array<i64: 128, 128>}, {pipeline_mode = #tpu.pipeline_mode<synchronous>, transform_indices = @transform_4, window_bounds = array<i64: 128, 128>}, {pipeline_mode = #tpu.pipeline_mode<synchronous>, transform_indices = @transform_5, window_bounds = array<i64: 128, 128>}, {pipeline_mode = #tpu.pipeline_mode<synchronous>, transform_indices = @transform_6, window_bounds = array<i64: 1, 128>}, {pipeline_mode = #tpu.pipeline_mode<synchronous>, transform_indices = @transform_7, window_bounds = array<i64: 128, 128>}, {pipeline_mode = #tpu.pipeline_mode<synchronous>, transform_indices = @transform_8, window_bounds = array<i64: 1, 128>}, {pipeline_mode = #tpu.pipeline_mode<synchronous>, transform_indices = @transform_9, window_bounds = array<i64: 128, 128>}, {pipeline_mode = #tpu.pipeline_mode<synchronous>, transform_indices = @transform_10, window_bounds = array<i64: 1, 128>}, {transform_indices = @transform_11, window_bounds = array<i64: 8, 128>}]} {
    %c0 = arith.constant 0 : index
    %c0_0 = arith.constant 0 : index
    %0 = vector.load %arg1[%c0, %c0_0] : memref<8x1xi32, #tpu.memory_space<vmem>>, vector<8x1xi32>
    %c0_1 = arith.constant 0 : index
    %c0_2 = arith.constant 0 : index
    %1 = vector.load %arg2[%c0_1, %c0_2] : memref<8x1xi32, #tpu.memory_space<vmem>>, vector<8x1xi32>
    %2 = tpu.iota {dimensions = array<i32: 1>} : vector<8x128xi32>
    %3 = vector.broadcast %0 : vector<8x1xi32> to vector<8x128xi32>
    %4 = arith.cmpi eq, %2, %3 : vector<8x128xi32>
    %5 = arith.extui %4 : vector<8x128xi1> to vector<8x128xi32>
    %6 = arith.sitofp %5 : vector<8x128xi32> to vector<8x128xf32>
    %7 = tpu.iota {dimensions = array<i32: 1>} : vector<8x128xi32>
    %8 = vector.broadcast %1 : vector<8x1xi32> to vector<8x128xi32>
    %9 = arith.cmpi eq, %7, %8 : vector<8x128xi32>
    %10 = arith.extui %9 : vector<8x128xi1> to vector<8x128xi32>
    %11 = arith.sitofp %10 : vector<8x128xi32> to vector<8x128xf32>
    %c0_3 = arith.constant 0 : index
    %c0_4 = arith.constant 0 : index
    %12 = vector.load %arg3[%c0_3, %c0_4] : memref<128x128xf32, #tpu.memory_space<vmem>>, vector<128x128xf32>
    %cst = arith.constant dense<0.000000e+00> : vector<8x128xf32>
    %13 = tpu.matmul %6, %12, %cst {dimension_numbers = #tpu.dot_dimension_numbers<[1], [0], [0], [1], [0, 0, 1, 1], [], []>} : vector<8x128xf32>, vector<128x128xf32>, vector<8x128xf32> -> vector<8x128xf32>
    %c0_5 = arith.constant 0 : index
    %c0_6 = arith.constant 0 : index
    %14 = vector.load %arg4[%c0_5, %c0_6] : memref<128x128xf32, #tpu.memory_space<vmem>>, vector<128x128xf32>
    %cst_7 = arith.constant dense<0.000000e+00> : vector<8x128xf32>
    %15 = tpu.matmul %11, %14, %cst_7 {dimension_numbers = #tpu.dot_dimension_numbers<[1], [0], [0], [1], [0, 0, 1, 1], [], []>} : vector<8x128xf32>, vector<128x128xf32>, vector<8x128xf32> -> vector<8x128xf32>
    %c0_8 = arith.constant 0 : index
    %c0_9 = arith.constant 0 : index
    %16 = vector.load %arg5[%c0_8, %c0_9] : memref<128x128xf32, #tpu.memory_space<vmem>>, vector<128x128xf32>
    %c0_10 = arith.constant 0 : index
    %c0_11 = arith.constant 0 : index
    %17 = vector.load %arg6[%c0_10, %c0_11] : memref<128x128xf32, #tpu.memory_space<vmem>>, vector<128x128xf32>
    %c0_12 = arith.constant 0 : index
    %c0_13 = arith.constant 0 : index
    %18 = vector.load %arg7[%c0_12, %c0_13] : memref<1x128xf32, #tpu.memory_space<vmem>>, vector<1x128xf32>
    %cst_14 = arith.constant dense<0.000000e+00> : vector<8x128xf32>
    %19 = tpu.matmul %13, %16, %cst_14 {dimension_numbers = #tpu.dot_dimension_numbers<[1], [0], [0], [1], [0, 0, 1, 1], [], []>} : vector<8x128xf32>, vector<128x128xf32>, vector<8x128xf32> -> vector<8x128xf32>
    %cst_15 = arith.constant dense<0.000000e+00> : vector<8x128xf32>
    %20 = tpu.matmul %15, %17, %cst_15 {dimension_numbers = #tpu.dot_dimension_numbers<[1], [0], [0], [1], [0, 0, 1, 1], [], []>} : vector<8x128xf32>, vector<128x128xf32>, vector<8x128xf32> -> vector<8x128xf32>
    %21 = arith.addf %19, %20 : vector<8x128xf32>
    %22 = vector.broadcast %18 : vector<1x128xf32> to vector<8x128xf32>
    %23 = arith.addf %21, %22 : vector<8x128xf32>
    %cst_16 = arith.constant 0.000000e+00 : f32
    %24 = vector.broadcast %cst_16 : f32 to vector<8x128xf32>
    %25 = arith.maximumf %23, %24 : vector<8x128xf32>
    %c0_17 = arith.constant 0 : index
    %c0_18 = arith.constant 0 : index
    %26 = vector.load %arg8[%c0_17, %c0_18] : memref<128x128xf32, #tpu.memory_space<vmem>>, vector<128x128xf32>
    %c0_19 = arith.constant 0 : index
    %c0_20 = arith.constant 0 : index
    %27 = vector.load %arg9[%c0_19, %c0_20] : memref<1x128xf32, #tpu.memory_space<vmem>>, vector<1x128xf32>
    %cst_21 = arith.constant dense<0.000000e+00> : vector<8x128xf32>
    %28 = tpu.matmul %25, %26, %cst_21 {dimension_numbers = #tpu.dot_dimension_numbers<[1], [0], [0], [1], [0, 0, 1, 1], [], []>} : vector<8x128xf32>, vector<128x128xf32>, vector<8x128xf32> -> vector<8x128xf32>
    %29 = vector.broadcast %27 : vector<1x128xf32> to vector<8x128xf32>
    %30 = arith.addf %28, %29 : vector<8x128xf32>
    %cst_22 = arith.constant 0.000000e+00 : f32
    %31 = vector.broadcast %cst_22 : f32 to vector<8x128xf32>
    %32 = arith.maximumf %30, %31 : vector<8x128xf32>
    %c0_23 = arith.constant 0 : index
    %c0_24 = arith.constant 0 : index
    %33 = vector.load %arg10[%c0_23, %c0_24] : memref<128x128xf32, #tpu.memory_space<vmem>>, vector<128x128xf32>
    %c0_25 = arith.constant 0 : index
    %c0_26 = arith.constant 0 : index
    %34 = vector.load %arg11[%c0_25, %c0_26] : memref<1x128xf32, #tpu.memory_space<vmem>>, vector<1x128xf32>
    %cst_27 = arith.constant dense<0.000000e+00> : vector<8x128xf32>
    %35 = tpu.matmul %32, %33, %cst_27 {dimension_numbers = #tpu.dot_dimension_numbers<[1], [0], [0], [1], [0, 0, 1, 1], [], []>} : vector<8x128xf32>, vector<128x128xf32>, vector<8x128xf32> -> vector<8x128xf32>
    %36 = vector.broadcast %34 : vector<1x128xf32> to vector<8x128xf32>
    %37 = arith.addf %35, %36 : vector<8x128xf32>
    %cst_28 = arith.constant 0.000000e+00 : f32
    %38 = vector.broadcast %cst_28 : f32 to vector<8x128xf32>
    %39 = arith.maximumf %37, %38 : vector<8x128xf32>
    %c0_29 = arith.constant 0 : index
    %c0_30 = arith.constant 0 : index
    %40 = vector.load %arg12[%c0_29, %c0_30] : memref<8x128xf32, #tpu.memory_space<vmem>>, vector<8x128xf32>
    tpu.vector_store %arg12[%c0_29, %c0_30], %39 {strides = array<i32>} : memref<8x128xf32, #tpu.memory_space<vmem>>, vector<8x128xf32>,
    return
  }
  func.func @transform_0(%arg0: i32) -> (i32, i32) {
    %c0_i32 = arith.constant 0 : i32
    %c0_i32_0 = arith.constant 0 : i32
    return %arg0, %c0_i32 : i32, i32
  }
  func.func @transform_1(%arg0: i32) -> (i32, i32) {
    %c0_i32 = arith.constant 0 : i32
    %c0_i32_0 = arith.constant 0 : i32
    return %arg0, %c0_i32 : i32, i32
  }
  func.func @transform_2(%arg0: i32) -> (i32, i32) {
    %c0_i32 = arith.constant 0 : i32
    %c0_i32_0 = arith.constant 0 : i32
    %c0_i32_1 = arith.constant 0 : i32
    return %c0_i32, %c0_i32_0 : i32, i32
  }
  func.func @transform_3(%arg0: i32) -> (i32, i32) {
    %c0_i32 = arith.constant 0 : i32
    %c0_i32_0 = arith.constant 0 : i32
    %c0_i32_1 = arith.constant 0 : i32
    return %c0_i32, %c0_i32_0 : i32, i32
  }
  func.func @transform_4(%arg0: i32) -> (i32, i32) {
    %c0_i32 = arith.constant 0 : i32
    %c0_i32_0 = arith.constant 0 : i32
    %c0_i32_1 = arith.constant 0 : i32
    return %c0_i32, %c0_i32_0 : i32, i32
  }
  func.func @transform_5(%arg0: i32) -> (i32, i32) {
    %c0_i32 = arith.constant 0 : i32
    %c0_i32_0 = arith.constant 0 : i32
    %c0_i32_1 = arith.constant 0 : i32
    return %c0_i32, %c0_i32_0 : i32, i32
  }
  func.func @transform_6(%arg0: i32) -> (i32, i32) {
    %c0_i32 = arith.constant 0 : i32
    %c0_i32_0 = arith.constant 0 : i32
    %c0_i32_1 = arith.constant 0 : i32
    return %c0_i32, %c0_i32_0 : i32, i32
  }
  func.func @transform_7(%arg0: i32) -> (i32, i32) {
    %c0_i32 = arith.constant 0 : i32
    %c0_i32_0 = arith.constant 0 : i32
    %c0_i32_1 = arith.constant 0 : i32
    return %c0_i32, %c0_i32_0 : i32, i32
  }
  func.func @transform_8(%arg0: i32) -> (i32, i32) {
    %c0_i32 = arith.constant 0 : i32
    %c0_i32_0 = arith.constant 0 : i32
    %c0_i32_1 = arith.constant 0 : i32
    return %c0_i32, %c0_i32_0 : i32, i32
  }
  func.func @transform_9(%arg0: i32) -> (i32, i32) {
    %c0_i32 = arith.constant 0 : i32
    %c0_i32_0 = arith.constant 0 : i32
    %c0_i32_1 = arith.constant 0 : i32
    return %c0_i32, %c0_i32_0 : i32, i32
  }
  func.func @transform_10(%arg0: i32) -> (i32, i32) {
    %c0_i32 = arith.constant 0 : i32
    %c0_i32_0 = arith.constant 0 : i32
    %c0_i32_1 = arith.constant 0 : i32
    return %c0_i32, %c0_i32_0 : i32, i32
  }
  func.func @transform_11(%arg0: i32) -> (i32, i32) {
    %c0_i32 = arith.constant 0 : i32
    %c0_i32_0 = arith.constant 0 : i32
    return %arg0, %c0_i32 : i32, i32
  }
}

</mosaic_0001>

<bundles_post_ra>
// kernel: tpu_custom_call.1
= control target key start
LH: loop header
LB: loop body
LE: loop exit
PB: predicated region body
PF: predicated region fallthrough
CT: control target
= control target key end

     0   :  { %16 = vsyncpa [#allocation3], 0  ;;  %s1415_s0 = inlined_call_operand.vmem [shape: s32[8,1], index: 0, kind: input, shape index: {}]   ;;  %s1416_s1 = inlined_call_operand.vmem [shape: s32[8,1], index: 1, kind: input, shape index: {}]   ;;  %s1417_s2 = inlined_call_operand.hbm [shape: f32[128,128], index: 2, kind: input, shape index: {}]   ;;  %s1418_s3 = inlined_call_operand.hbm [shape: f32[128,128], index: 3, kind: input, shape index: {}]   ;;  %s1419_s4 = inlined_call_operand.hbm [shape: f32[128,128], index: 4, kind: input, shape index: {}]   ;;  %s1420_s5 = inlined_call_operand.hbm [shape: f32[128,128], index: 5, kind: input, shape index: {}]   ;;  %s1421_s6 = inlined_call_operand.vmem [shape: f32[1,128], index: 6, kind: input, shape index: {}]   ;;  %s1422_s7 = inlined_call_operand.hbm [shape: f32[128,128], index: 7, kind: input, shape index: {}]   ;;  %s1423_s8 = inlined_call_operand.vmem [shape: f32[1,128], index: 8, kind: input, shape index: {}]   ;;  %s1424_s9 = inlined_call_operand.hbm [shape: f32[128,128], index: 9, kind: input, shape index: {}]   ;;  %s1425_s10 = inlined_call_operand.vmem [shape: f32[1,128], index: 10, kind: input, shape index: {}]   ;;  %s1426_s11 = inlined_call_operand.hbm [shape: f32[8,128], index: 11, kind: output, shape index: {}]  }
   0x1   :  { %17 = vsyncpa [#allocation6], 0 }
   0x2   :  { %18 = vsyncpa [#allocation9], 0 }
   0x3   :  { %19 = vsyncpa [#allocation12], 0 }
   0x4   :  { %20 = vsyncpa [#allocation4], 0  ;;  %s1180_s17 = smov [#allocation5]   ;;  %s1181_s19 = smov [#allocation8]  }
   0x5   :  { %s42_s18 = sshll.u32 %s1180_s17, 4  ;;  %s66_s20 = sshll.u32 %s1181_s19, 4  ;;  %s43_s18 = int_to_ptr.vmem [resolvable:$true] %s42_s18  ;;  %s67_s20 = int_to_ptr.vmem [resolvable:$true] %s66_s20 }
   0x6   :  { %s1038_s21 = scalar_lea.vmem %s43_s18, 2048  ;;  %p1043_p1 = scmp.lt.s32.totalorder %s43_s18, %s43_s18 }
   0x7   :  { %p1039_p0 = scmp.ne.s32.totalorder %s43_s18, %s1038_s21  ;;  %p1044_p2 = scmp.lt.s32.totalorder %s1038_s21, %s1038_s21 }
   0x9   :  { %p1045_p3 = por %p1044_p2, %p1043_p1 }
   0xb   :  { %p1046_p4 = pnand %p1045_p3, %p1039_p0 }
   0xd   :  { %1049 = shalt.err (!%p1046_p4)
}
   0xe   :  { %s1182_s22 = smov 128   ;;  %s1183_s23 = smov 8  }
   0xf   :  { %48 = dma.hbm_to_vmem [thread:$0]  %s1418_s3, 2048, %s43_s18, [#allocation6], %s1182_s22, %s1182_s22, %s1183_s23  }
  0x10   :  { %s1058_s26 = scalar_lea.vmem %s67_s20, 2048  ;;  %p1063_p6 = scmp.lt.s32.totalorder %s67_s20, %s67_s20 }
  0x11   :  { %p1059_p5 = scmp.ne.s32.totalorder %s67_s20, %s1058_s26  ;;  %p1064_p7 = scmp.lt.s32.totalorder %s1058_s26, %s1058_s26 }
  0x13   :  { %p1065_p8 = por %p1064_p7, %p1063_p6 }
  0x15   :  { %p1066_p9 = pnand %p1065_p8, %p1059_p5 }
  0x17   :  { %1069 = shalt.err (!%p1066_p9)
}
  0x18   :  { %72 = dma.hbm_to_vmem [thread:$0]  %s1420_s5, 2048, %s67_s20, [#allocation9], %s1182_s22, %s1182_s22, %s1183_s23  }
  0x19   :  { %s1184_s29 = smov [#allocation2]   ;;  %s1185_s12 = smov [#allocation7]  }
  0x1a   :  { %s30_s30 = sshll.u32 %s1184_s29, 4  ;;  %s54_s13 = sshll.u32 %s1185_s12, 4  ;;  %s31_s30 = int_to_ptr.vmem [resolvable:$true] %s30_s30  ;;  %s55_s13 = int_to_ptr.vmem [resolvable:$true] %s54_s13 }
  0x1b   :  { %s1078_s3 = scalar_lea.vmem %s31_s30, 2048  ;;  %p1083_p11 = scmp.lt.s32.totalorder %s31_s30, %s31_s30 }
  0x1c   :  { %p1079_p10 = scmp.ne.s32.totalorder %s31_s30, %s1078_s3  ;;  %p1084_p12 = scmp.lt.s32.totalorder %s1078_s3, %s1078_s3 }
  0x1e   :  { %p1085_p13 = por %p1084_p12, %p1083_p11 }
  0x20   :  { %p1086_p0 = pnand %p1085_p13, %p1079_p10 }
  0x22   :  { %1089 = shalt.err (!%p1086_p0)
}
  0x23   :  { %36 = dma.hbm_to_vmem [thread:$0]  %s1417_s2, 2048, %s31_s30, [#allocation3], %s1182_s22, %s1182_s22, %s1183_s23  }
  0x24   :  { %s1098_s5 = scalar_lea.vmem %s55_s13, 2048  ;;  %p1103_p2 = scmp.lt.s32.totalorder %s55_s13, %s55_s13 }
  0x25   :  { %p1099_p1 = scmp.ne.s32.totalorder %s55_s13, %s1098_s5  ;;  %p1104_p3 = scmp.lt.s32.totalorder %s1098_s5, %s1098_s5 }
  0x27   :  { %p1105_p4 = por %p1104_p3, %p1103_p2 }
  0x29   :  { %p1106_p5 = pnand %p1105_p4, %p1099_p1 }
  0x2b   :  { %1109 = shalt.err (!%p1106_p5)
}
  0x2c   :  { %60 = dma.hbm_to_vmem [thread:$0]  %s1419_s4, 2048, %s55_s13, [#allocation6], %s1182_s22, %s1182_s22, %s1183_s23  }
  0x2d   :  { %s1186_s18 = smov [#allocation10]   ;;  %s1187_s20 = smov [#allocation11]  }
  0x2e   :  { %s80_s19 = sshll.u32 %s1186_s18, 4  ;;  %s94_s21 = sshll.u32 %s1187_s20, 4  ;;  %s81_s19 = int_to_ptr.vmem [resolvable:$true] %s80_s19  ;;  %s95_s21 = int_to_ptr.vmem [resolvable:$true] %s94_s21 }
  0x2f   :  { %s1118_s2 = scalar_lea.vmem %s81_s19, 2048  ;;  %p1123_p7 = scmp.lt.s32.totalorder %s81_s19, %s81_s19 }
  0x30   :  { %p1119_p6 = scmp.ne.s32.totalorder %s81_s19, %s1118_s2  ;;  %p1124_p8 = scmp.lt.s32.totalorder %s1118_s2, %s1118_s2 }
  0x32   :  { %p1125_p9 = por %p1124_p8, %p1123_p7 }
  0x34   :  { %p1126_p10 = pnand %p1125_p9, %p1119_p6 }
  0x36   :  { %1129 = shalt.err (!%p1126_p10)
}
  0x37   :  { %86 = dma.hbm_to_vmem [thread:$0]  %s1422_s7, 2048, %s81_s19, [#allocation9], %s1182_s22, %s1182_s22, %s1183_s23  }
  0x38   :  { %s1138_s4 = scalar_lea.vmem %s95_s21, 2048  ;;  %p1143_p12 = scmp.lt.s32.totalorder %s95_s21, %s95_s21 }
  0x39   :  { %p1139_p11 = scmp.ne.s32.totalorder %s95_s21, %s1138_s4  ;;  %p1144_p13 = scmp.lt.s32.totalorder %s1138_s4, %s1138_s4 }
  0x3b   :  { %p1145_p0 = por %p1144_p13, %p1143_p12 }
  0x3d   :  { %p1146_p1 = pnand %p1145_p0, %p1139_p11 }
  0x3f   :  { %1149 = shalt.err (!%p1146_p1)
}
  0x40   :  { %100 = dma.hbm_to_vmem [thread:$0]  %s1424_s9, 2048, %s95_s21, [#allocation12], %s1182_s22, %s1182_s22, %s1183_s23  }
  0x41   :  { %1170 = dma.done.wait [#allocation3], 2048  }
  0x42   :  { %1171 = vsyncadd [#allocation3], 4294965248 }
  0x43   :  { %1172 = dma.done.wait [#allocation6], 4096  }
  0x44   :  { %1173 = vsyncadd [#allocation6], 4294963200 }
  0x45   :  { %1174 = dma.done.wait [#allocation9], 4096  }
  0x46   :  { %1175 = vsyncadd [#allocation9], 4294963200 }
  0x47   :  { %1176 = dma.done.wait [#allocation12], 2048  }
  0x48   :  { %1177 = vsyncadd [#allocation12], 4294965248  ;;  %v1188_v0 = vmov 0   ;;  %v1189_v1 = vmov 0.0   ;;  %vm1190_vm0 = vmmov 0   ;;  %v121_v2 = vld [vmem:[%s1415_s0] sm:$0xff]  ;;  %v123_v36 = vlaneseq }
  0x49   :  { %1029 = vset.pattern.permute.xlu0 %v1188_v0  ;;  %806 = vmatprep.subr.mxu0 %v1189_v1  ;;  %v152_v3 = vld [vmem:[#allocation2 + $0x78] sm:$0xff]  ;;  %v151_v4 = vld [vmem:[#allocation2 + $0x70] sm:$0xff]  ;;  %v122_v6 = vld [vmem:[%s1416_s1] sm:$0xff]  ;;  %v1191_v40 = vmov 1.0   ;;  %s1192_s12 = smov [#allocation13]  }
  0x4a   :  { %841 = vmatprep.subr.mxu1 %v1189_v1  ;;  %838 = vmatprep.mubr.msk.f32.mxu0 %vm1190_vm0, %v1189_v1  ;;  %v238_v5 = vld [vmem:[#allocation5 + $0x78] sm:$0xff]  ;;  %v150_v7 = vld [vmem:[#allocation2 + $0x68] sm:$0xff]  ;;  %v237_v8 = vld [vmem:[#allocation5 + $0x70] sm:$0xff]  ;;  %v124_v37 = vand.u32 127, %v123_v36  ;;  %s685_s13 = sshll.u32 %s1192_s12, 4  ;;  %s686_s13 = int_to_ptr.vmem [resolvable:$true] %s685_s13 }
  0x4b   :  { %873 = vmatprep.mubr.msk.f32.mxu1 %vm1190_vm0, %v1189_v1  ;;  %126 = vperm.xlu0 %1029, %v121_v2   ;;  %v149_v9 = vld [vmem:[#allocation2 + $0x60] sm:$0xff]  ;;  %v236_v10 = vld [vmem:[#allocation5 + $0x68] sm:$0xff]  ;;  %v148_v11 = vld [vmem:[#allocation2 + $0x58] sm:$0xff]  ;;  %s1150_s3 = scalar_lea.vmem %s686_s13, 128  ;;  %p1155_p3 = scmp.lt.s32.totalorder %s686_s13, %s686_s13 }
  0x4c   :  { %807 = vmatpush3.msra.mxu0 %v152_v3  ;;  %842 = vmatpush3.msra.mxu1 %v238_v5  ;;  %v235_v12 = vld [vmem:[#allocation5 + $0x60] sm:$0xff]  ;;  %v147_v13 = vld [vmem:[#allocation2 + $0x50] sm:$0xff]  ;;  %v234_v14 = vld [vmem:[#allocation5 + $0x58] sm:$0xff]  ;;  %p1151_p2 = scmp.ne.s32.totalorder %s686_s13, %s1150_s3  ;;  %p1156_p4 = scmp.lt.s32.totalorder %s1150_s3, %s1150_s3 }
  0x4d   :  { %808 = vmatprep.subr.mxu0 %v1189_v1  ;;  %843 = vmatprep.subr.mxu1 %v1189_v1  ;;  %v146_v15 = vld [vmem:[#allocation2 + $0x48] sm:$0xff]  ;;  %v233_v16 = vld [vmem:[#allocation5 + $0x50] sm:$0xff]  ;;  %v145_v17 = vld [vmem:[#allocation2 + $0x40] sm:$0xff] }
  0x4e   :  { %809 = vmatpush3.msra.mxu0 %v151_v4  ;;  %844 = vmatpush3.msra.mxu1 %v237_v8  ;;  %v232_v18 = vld [vmem:[#allocation5 + $0x48] sm:$0xff]  ;;  %v144_v19 = vld [vmem:[#allocation2 + $0x38] sm:$0xff]  ;;  %v231_v20 = vld [vmem:[#allocation5 + $0x40] sm:$0xff]  ;;  %p1157_p5 = por %p1156_p4, %p1155_p3 }
  0x4f   :  { %810 = vmatprep.subr.mxu0 %v1189_v1  ;;  %132 = vperm.xlu0 %1029, %v122_v6   ;;  %v143_v21 = vld [vmem:[#allocation2 + $0x30] sm:$0xff]  ;;  %v230_v22 = vld [vmem:[#allocation5 + $0x38] sm:$0xff]  ;;  %v142_v23 = vld [vmem:[#allocation2 + $0x28] sm:$0xff] }
  0x50   :  { %811 = vmatpush3.msra.mxu0 %v150_v7  ;;  %845 = vmatprep.subr.mxu1 %v1189_v1  ;;  %v229_v24 = vld [vmem:[#allocation5 + $0x30] sm:$0xff]  ;;  %v141_v25 = vld [vmem:[#allocation2 + $0x20] sm:$0xff]  ;;  %v228_v26 = vld [vmem:[#allocation5 + $0x28] sm:$0xff]  ;;  %p1158_p6 = pnand %p1157_p5, %p1151_p2 }
  0x51   :  { %812 = vmatprep.subr.mxu0 %v1189_v1  ;;  %846 = vmatpush3.msra.mxu1 %v236_v10  ;;  %v140_v27 = vld [vmem:[#allocation2 + $0x18] sm:$0xff]  ;;  %v227_v28 = vld [vmem:[#allocation5 + $0x20] sm:$0xff]  ;;  %v139_v29 = vld [vmem:[#allocation2 + $0x10] sm:$0xff] }
  0x52   :  { %813 = vmatpush3.msra.mxu0 %v149_v9  ;;  %847 = vmatprep.subr.mxu1 %v1189_v1  ;;  %v226_v30 = vld [vmem:[#allocation5 + $0x18] sm:$0xff]  ;;  %v138_v31 = vld [vmem:[#allocation2 + $0x8] sm:$0xff]  ;;  %v225_v32 = vld [vmem:[#allocation5 + $0x10] sm:$0xff] }
  0x53   :  { %814 = vmatprep.subr.mxu0 %v1189_v1  ;;  %848 = vmatpush3.msra.mxu1 %v235_v12  ;;  %v137_v33 = vld [vmem:[#allocation2] sm:$0xff]  ;;  %v224_v34 = vld [vmem:[#allocation5 + $0x8] sm:$0xff]  ;;  %v340_v39 = vld [vmem:[#allocation8 + $0x78] sm:$0xff] }
  0x54   :  { %815 = vmatpush3.msra.mxu0 %v148_v11  ;;  %849 = vmatprep.subr.mxu1 %v1189_v1  ;;  %v223_v35 = vld [vmem:[#allocation5] sm:$0xff]  ;;  %v339_v41 = vld [vmem:[#allocation8 + $0x70] sm:$0xff]  ;;  %v324_v43 = vld [vmem:[#allocation7 + $0x78] sm:$0xff] }
  0x55   :  { %816 = vmatprep.subr.mxu0 %v1189_v1  ;;  %850 = vmatpush3.msra.mxu1 %v234_v14  ;;  %v338_v44 = vld [vmem:[#allocation8 + $0x68] sm:$0xff]  ;;  %v323_v45 = vld [vmem:[#allocation7 + $0x70] sm:$0xff]  ;;  %v337_v46 = vld [vmem:[#allocation8 + $0x60] sm:$0xff] }
  0x56   :  { %817 = vmatpush3.msra.mxu0 %v147_v13  ;;  %851 = vmatprep.subr.mxu1 %v1189_v1  ;;  %v322_v47 = vld [vmem:[#allocation7 + $0x68] sm:$0xff]  ;;  %v336_v48 = vld [vmem:[#allocation8 + $0x58] sm:$0xff]  ;;  %v321_v49 = vld [vmem:[#allocation7 + $0x60] sm:$0xff] }
  0x57   :  { %818 = vmatprep.subr.mxu0 %v1189_v1  ;;  %852 = vmatpush3.msra.mxu1 %v233_v16  ;;  %v335_v50 = vld [vmem:[#allocation8 + $0x50] sm:$0xff]  ;;  %v320_v51 = vld [vmem:[#allocation7 + $0x58] sm:$0xff]  ;;  %v334_v52 = vld [vmem:[#allocation8 + $0x48] sm:$0xff] }
  0x58   :  { %819 = vmatpush3.msra.mxu0 %v146_v15  ;;  %853 = vmatprep.subr.mxu1 %v1189_v1  ;;  %v319_v53 = vld [vmem:[#allocation7 + $0x50] sm:$0xff]  ;;  %v333_v54 = vld [vmem:[#allocation8 + $0x40] sm:$0xff]  ;;  %v318_v55 = vld [vmem:[#allocation7 + $0x48] sm:$0xff] }
  0x59   :  { %820 = vmatprep.subr.mxu0 %v1189_v1  ;;  %854 = vmatpush3.msra.mxu1 %v232_v18  ;;  %v332_v56 = vld [vmem:[#allocation8 + $0x38] sm:$0xff]  ;;  %v317_v57 = vld [vmem:[#allocation7 + $0x40] sm:$0xff]  ;;  %v331_v58 = vld [vmem:[#allocation8 + $0x30] sm:$0xff] }
  0x5a   :  { %821 = vmatpush3.msra.mxu0 %v145_v17  ;;  %855 = vmatprep.subr.mxu1 %v1189_v1  ;;  %v316_v59 = vld [vmem:[#allocation7 + $0x38] sm:$0xff]  ;;  %v330_v60 = vld [vmem:[#allocation8 + $0x28] sm:$0xff]  ;;  %v315_v61 = vld [vmem:[#allocation7 + $0x30] sm:$0xff] }
  0x5b   :  { %822 = vmatprep.subr.mxu0 %v1189_v1  ;;  %856 = vmatpush3.msra.mxu1 %v231_v20  ;;  %v329_v62 = vld [vmem:[#allocation8 + $0x20] sm:$0xff]  ;;  %v314_v63 = vld [vmem:[#allocation7 + $0x28] sm:$0xff]  ;;  %v328_v0 = vld [vmem:[#allocation8 + $0x18] sm:$0xff] }
  0x5c   :  { %823 = vmatpush3.msra.mxu0 %v144_v19  ;;  %857 = vmatprep.subr.mxu1 %v1189_v1  ;;  %v313_v2 = vld [vmem:[#allocation7 + $0x20] sm:$0xff]  ;;  %v312_v3 = vld [vmem:[#allocation7 + $0x18] sm:$0xff]  ;;  %v311_v4 = vld [vmem:[#allocation7 + $0x10] sm:$0xff] }
  0x5d   :  { %824 = vmatprep.subr.mxu0 %v1189_v1  ;;  %858 = vmatpush3.msra.mxu1 %v230_v22  ;;  %v310_v5 = vld [vmem:[#allocation7 + $0x8] sm:$0xff]  ;;  %v327_v6 = vld [vmem:[#allocation8 + $0x10] sm:$0xff]  ;;  %v309_v7 = vld [vmem:[#allocation7] sm:$0xff] }
  0x5e   :  { %825 = vmatpush3.msra.mxu0 %v143_v21  ;;  %859 = vmatprep.subr.mxu1 %v1189_v1  ;;  %v326_v8 = vld [vmem:[#allocation8 + $0x8] sm:$0xff]  ;;  %v325_v9 = vld [vmem:[#allocation8] sm:$0xff]  ;;  %v505_v12 = vld [vmem:[#allocation10 + $0x78] sm:$0xff] }
  0x5f   :  { %826 = vmatprep.subr.mxu0 %v1189_v1  ;;  %860 = vmatpush3.msra.mxu1 %v229_v24  ;;  %v504_v14 = vld [vmem:[#allocation10 + $0x70] sm:$0xff]  ;;  %v503_v16 = vld [vmem:[#allocation10 + $0x68] sm:$0xff]  ;;  %v502_v17 = vld [vmem:[#allocation10 + $0x60] sm:$0xff] }
  0x60   :  { %827 = vmatpush3.msra.mxu0 %v142_v23  ;;  %861 = vmatprep.subr.mxu1 %v1189_v1  ;;  %v501_v18 = vld [vmem:[#allocation10 + $0x58] sm:$0xff]  ;;  %v500_v19 = vld [vmem:[#allocation10 + $0x50] sm:$0xff]  ;;  %v499_v20 = vld [vmem:[#allocation10 + $0x48] sm:$0xff] }
  0x61   :  { %828 = vmatprep.subr.mxu0 %v1189_v1  ;;  %862 = vmatpush3.msra.mxu1 %v228_v26  ;;  %v498_v21 = vld [vmem:[#allocation10 + $0x40] sm:$0xff]  ;;  %v497_v22 = vld [vmem:[#allocation10 + $0x38] sm:$0xff]  ;;  %v496_v23 = vld [vmem:[#allocation10 + $0x30] sm:$0xff] }
  0x62   :  { %829 = vmatpush3.msra.mxu0 %v141_v25  ;;  %863 = vmatprep.subr.mxu1 %v1189_v1  ;;  %v495_v24 = vld [vmem:[#allocation10 + $0x28] sm:$0xff]  ;;  %v494_v25 = vld [vmem:[#allocation10 + $0x20] sm:$0xff]  ;;  %v493_v26 = vld [vmem:[#allocation10 + $0x18] sm:$0xff] }
  0x63   :  { %830 = vmatprep.subr.mxu0 %v1189_v1  ;;  %864 = vmatpush3.msra.mxu1 %v227_v28  ;;  %v491_v28 = vld [vmem:[#allocation10 + $0x8] sm:$0xff] }
  0x64   :  { %831 = vmatpush3.msra.mxu0 %v140_v27  ;;  %865 = vmatprep.subr.mxu1 %v1189_v1  ;;  %v492_v27 = vld [vmem:[#allocation10 + $0x10] sm:$0xff]  ;;  %v593_v36 = vld [vmem:[#allocation11 + $0x48] sm:$0xff] }
  0x65   :  { %832 = vmatprep.subr.mxu0 %v1189_v1  ;;  %866 = vmatpush3.msra.mxu1 %v226_v30  ;;  %v599_v30 = vld [vmem:[#allocation11 + $0x78] sm:$0xff] }
  0x66   :  { %833 = vmatpush3.msra.mxu0 %v139_v29  ;;  %867 = vmatprep.subr.mxu1 %v1189_v1  ;;  %v490_v29 = vld [vmem:[#allocation10] sm:$0xff] }
  0x67   :  { %834 = vmatprep.subr.mxu0 %v1189_v1  ;;  %868 = vmatpush3.msra.mxu1 %v225_v32  ;;  %v597_v32 = vld [vmem:[#allocation11 + $0x68] sm:$0xff] }
  0x68   :  { %835 = vmatpush3.msra.mxu0 %v138_v31  ;;  %869 = vmatprep.subr.mxu1 %v1189_v1  ;;  %v598_v31 = vld [vmem:[#allocation11 + $0x70] sm:$0xff] }
  0x69   :  { %836 = vmatprep.subr.mxu0 %v1189_v1  ;;  %870 = vmatpush3.msra.mxu1 %v224_v34  ;;  %v595_v34 = vld [vmem:[#allocation11 + $0x58] sm:$0xff] }
  0x6a   :  { %837 = vmatpush3.msra.mxu0 %v137_v33  ;;  %871 = vmatprep.subr.mxu1 %v1189_v1  ;;  %v596_v33 = vld [vmem:[#allocation11 + $0x60] sm:$0xff] }
  0x6b   :  { %876 = vmatprep.subr.mxu0 %v1189_v1  ;;  %872 = vmatpush3.msra.mxu1 %v223_v35  ;;  %v594_v35 = vld [vmem:[#allocation11 + $0x50] sm:$0xff] }
  0x6c   :  { %911 = vmatprep.subr.mxu1 %v1189_v1 }
  0xc6   :  { %v127_v38 = vpop.permute.xlu0 %126 }
  0xc7   :  { %vm128_vm1 = vcmp.eq.s32.totalorder %v124_v37, %v127_v38  ;;  %v591_v38 = vld [vmem:[#allocation11 + $0x38] sm:$0xff] }
  0xc8   :  { %839 = vmatmul.mubr.msk.f32.vlgmr.msra.gmra.mxu0 %vm128_vm1, %v1191_v40 }
  0xc9   :  { %877 = vmatpush3.msra.mxu0 %v340_v39  ;;  %908 = vmatprep.mubr.msk.f32.mxu0 %vm1190_vm0, %v1189_v1  ;;  %v590_v39 = vld [vmem:[#allocation11 + $0x30] sm:$0xff] }
  0xca   :  { %v133_v42 = vpop.permute.xlu0 %132  ;;  %878 = vmatprep.subr.mxu0 %v1189_v1 }
  0xcb   :  { %vm134_vm2 = vcmp.eq.s32.totalorder %v124_v37, %v133_v42  ;;  %879 = vmatpush3.msra.mxu0 %v339_v41  ;;  %v592_v37 = vld [vmem:[#allocation11 + $0x40] sm:$0xff]  ;;  %v587_v42 = vld [vmem:[#allocation11 + $0x18] sm:$0xff] }
  0xcc   :  { %874 = vmatmul.mubr.msk.f32.vlgmr.msra.gmra.mxu1 %vm134_vm2, %v1191_v40  ;;  %880 = vmatprep.subr.mxu0 %v1189_v1  ;;  %v589_v40 = vld [vmem:[#allocation11 + $0x28] sm:$0xff]  ;;  %v588_v41 = vld [vmem:[#allocation11 + $0x20] sm:$0xff] }
  0xcd   :  { %912 = vmatpush3.msra.mxu1 %v324_v43  ;;  %881 = vmatpush3.msra.mxu0 %v338_v44 }
  0xce   :  { %913 = vmatprep.subr.mxu1 %v1189_v1  ;;  %882 = vmatprep.subr.mxu0 %v1189_v1 }
  0xcf   :  { %914 = vmatpush3.msra.mxu1 %v323_v45  ;;  %883 = vmatpush3.msra.mxu0 %v337_v46  ;;  %v701_v45 = vld [vmem:[%s1421_s6] ss:$0 sm:$0xff] }
  0xd0   :  { %915 = vmatprep.subr.mxu1 %v1189_v1  ;;  %884 = vmatprep.subr.mxu0 %v1189_v1 }
  0xd1   :  { %916 = vmatpush3.msra.mxu1 %v322_v47  ;;  %885 = vmatpush3.msra.mxu0 %v336_v48 }
  0xd2   :  { %917 = vmatprep.subr.mxu1 %v1189_v1  ;;  %886 = vmatprep.subr.mxu0 %v1189_v1 }
  0xd3   :  { %918 = vmatpush3.msra.mxu1 %v321_v49  ;;  %887 = vmatpush3.msra.mxu0 %v335_v50 }
  0xd4   :  { %919 = vmatprep.subr.mxu1 %v1189_v1  ;;  %888 = vmatprep.subr.mxu0 %v1189_v1 }
  0xd5   :  { %920 = vmatpush3.msra.mxu1 %v320_v51  ;;  %889 = vmatpush3.msra.mxu0 %v334_v52  ;;  %v586_v51 = vld [vmem:[#allocation11 + $0x10] sm:$0xff]  ;;  %v585_v52 = vld [vmem:[#allocation11 + $0x8] sm:$0xff] }
  0xd6   :  { %921 = vmatprep.subr.mxu1 %v1189_v1  ;;  %890 = vmatprep.subr.mxu0 %v1189_v1 }
  0xd7   :  { %922 = vmatpush3.msra.mxu1 %v319_v53  ;;  %891 = vmatpush3.msra.mxu0 %v333_v54  ;;  %v584_v53 = vld [vmem:[#allocation11] sm:$0xff] }
  0xd8   :  { %923 = vmatprep.subr.mxu1 %v1189_v1  ;;  %892 = vmatprep.subr.mxu0 %v1189_v1  ;;  %v702_v54 = vld [vmem:[%s1423_s8] ss:$0 sm:$0xff] }
  0xd9   :  { %924 = vmatpush3.msra.mxu1 %v318_v55  ;;  %893 = vmatpush3.msra.mxu0 %v332_v56 }
  0xda   :  { %925 = vmatprep.subr.mxu1 %v1189_v1  ;;  %894 = vmatprep.subr.mxu0 %v1189_v1 }
  0xdb   :  { %926 = vmatpush3.msra.mxu1 %v317_v57  ;;  %895 = vmatpush3.msra.mxu0 %v331_v58 }
  0xdc   :  { %927 = vmatprep.subr.mxu1 %v1189_v1  ;;  %896 = vmatprep.subr.mxu0 %v1189_v1 }
  0xdd   :  { %928 = vmatpush3.msra.mxu1 %v316_v59  ;;  %897 = vmatpush3.msra.mxu0 %v330_v60  ;;  %v703_v59 = vld [vmem:[%s1425_s10] ss:$0 sm:$0xff] }
  0xde   :  { %929 = vmatprep.subr.mxu1 %v1189_v1  ;;  %898 = vmatprep.subr.mxu0 %v1189_v1 }
  0xdf   :  { %930 = vmatpush3.msra.mxu1 %v315_v61  ;;  %899 = vmatpush3.msra.mxu0 %v329_v62 }
  0xe0   :  { %931 = vmatprep.subr.mxu1 %v1189_v1  ;;  %900 = vmatprep.subr.mxu0 %v1189_v1 }
  0xe1   :  { %932 = vmatpush3.msra.mxu1 %v314_v63  ;;  %901 = vmatpush3.msra.mxu0 %v328_v0 }
  0xe2   :  { %933 = vmatprep.subr.mxu1 %v1189_v1  ;;  %902 = vmatprep.subr.mxu0 %v1189_v1 }
  0xe3   :  { %934 = vmatpush3.msra.mxu1 %v313_v2  ;;  %943 = vmatprep.mubr.msk.f32.mxu1 %vm1190_vm0, %v1189_v1 }
  0xe4   :  { %935 = vmatprep.subr.mxu1 %v1189_v1  ;;  %903 = vmatpush3.msra.mxu0 %v327_v6 }
  0xe5   :  { %936 = vmatpush3.msra.mxu1 %v312_v3  ;;  %904 = vmatprep.subr.mxu0 %v1189_v1 }
  0xe6   :  { %937 = vmatprep.subr.mxu1 %v1189_v1  ;;  %905 = vmatpush3.msra.mxu0 %v326_v8 }
  0xe7   :  { %938 = vmatpush3.msra.mxu1 %v311_v4  ;;  %906 = vmatprep.subr.mxu0 %v1189_v1 }
  0xe8   :  { %939 = vmatprep.subr.mxu1 %v1189_v1  ;;  %907 = vmatpush3.msra.mxu0 %v325_v9 }
  0xe9   :  { %940 = vmatpush3.msra.mxu1 %v310_v5  ;;  %946 = vmatprep.subr.mxu0 %v1189_v1 }
  0xea   :  { %941 = vmatprep.subr.mxu1 %v1189_v1 }
  0xeb   :  { %942 = vmatpush3.msra.mxu1 %v309_v7 }
  0xec   :  { %981 = vmatprep.subr.mxu1 %v1189_v1 }
 0x188   :  { %v219_v10 = vpop.f32.mrf.mxu0 }
 0x189   :  { %944 = vmatmul.mubr.f32.vlgmr.msra.gmra.mxu1 %v219_v10 }
 0x18a   :  { %v840_v11 = vpop.f32.mrf.mxu0  ;;  %1013 = vmatprep.mubr.msk.f32.mxu1 %vm1190_vm0, %v1189_v1  ;;  %982 = vmatpush3.msra.mxu1 %v599_v30 }
 0x18b   :  { %983 = vmatprep.subr.mxu1 %v1189_v1 }
 0x18c   :  { %v305_v13 = vpop.f32.mrf.mxu1  ;;  %984 = vmatpush3.msra.mxu1 %v598_v31 }
 0x18d   :  { %909 = vmatmul.mubr.f32.vlgmr.msra.gmra.mxu0 %v305_v13  ;;  %985 = vmatprep.subr.mxu1 %v1189_v1 }
 0x18e   :  { %v875_v15 = vpop.f32.mrf.mxu1  ;;  %947 = vmatpush3.msra.mxu0 %v505_v12  ;;  %978 = vmatprep.mubr.msk.f32.mxu0 %vm1190_vm0, %v1189_v1 }
 0x18f   :  { %948 = vmatprep.subr.mxu0 %v1189_v1  ;;  %986 = vmatpush3.msra.mxu1 %v597_v32 }
 0x190   :  { %949 = vmatpush3.msra.mxu0 %v504_v14  ;;  %987 = vmatprep.subr.mxu1 %v1189_v1 }
 0x191   :  { %950 = vmatprep.subr.mxu0 %v1189_v1  ;;  %988 = vmatpush3.msra.mxu1 %v596_v33 }
 0x192   :  { %951 = vmatpush3.msra.mxu0 %v503_v16  ;;  %989 = vmatprep.subr.mxu1 %v1189_v1 }
 0x193   :  { %952 = vmatprep.subr.mxu0 %v1189_v1  ;;  %990 = vmatpush3.msra.mxu1 %v595_v34 }
 0x194   :  { %953 = vmatpush3.msra.mxu0 %v502_v17  ;;  %991 = vmatprep.subr.mxu1 %v1189_v1 }
 0x195   :  { %954 = vmatprep.subr.mxu0 %v1189_v1  ;;  %992 = vmatpush3.msra.mxu1 %v594_v35 }
 0x196   :  { %955 = vmatpush3.msra.mxu0 %v501_v18  ;;  %993 = vmatprep.subr.mxu1 %v1189_v1 }
 0x197   :  { %956 = vmatprep.subr.mxu0 %v1189_v1  ;;  %994 = vmatpush3.msra.mxu1 %v593_v36 }
 0x198   :  { %957 = vmatpush3.msra.mxu0 %v500_v19  ;;  %995 = vmatprep.subr.mxu1 %v1189_v1 }
 0x199   :  { %958 = vmatprep.subr.mxu0 %v1189_v1  ;;  %996 = vmatpush3.msra.mxu1 %v592_v37 }
 0x19a   :  { %959 = vmatpush3.msra.mxu0 %v499_v20  ;;  %997 = vmatprep.subr.mxu1 %v1189_v1 }
 0x19b   :  { %960 = vmatprep.subr.mxu0 %v1189_v1  ;;  %998 = vmatpush3.msra.mxu1 %v591_v38 }
 0x19c   :  { %961 = vmatpush3.msra.mxu0 %v498_v21  ;;  %999 = vmatprep.subr.mxu1 %v1189_v1 }
 0x19d   :  { %962 = vmatprep.subr.mxu0 %v1189_v1  ;;  %1000 = vmatpush3.msra.mxu1 %v590_v39 }
 0x19e   :  { %963 = vmatpush3.msra.mxu0 %v497_v22  ;;  %1001 = vmatprep.subr.mxu1 %v1189_v1 }
 0x19f   :  { %964 = vmatprep.subr.mxu0 %v1189_v1  ;;  %1002 = vmatpush3.msra.mxu1 %v589_v40 }
 0x1a0   :  { %965 = vmatpush3.msra.mxu0 %v496_v23  ;;  %1003 = vmatprep.subr.mxu1 %v1189_v1 }
 0x1a1   :  { %966 = vmatprep.subr.mxu0 %v1189_v1  ;;  %1004 = vmatpush3.msra.mxu1 %v588_v41 }
 0x1a2   :  { %967 = vmatpush3.msra.mxu0 %v495_v24  ;;  %1005 = vmatprep.subr.mxu1 %v1189_v1 }
 0x1a3   :  { %968 = vmatprep.subr.mxu0 %v1189_v1  ;;  %1006 = vmatpush3.msra.mxu1 %v587_v42 }
 0x1a4   :  { %969 = vmatpush3.msra.mxu0 %v494_v25  ;;  %1007 = vmatprep.subr.mxu1 %v1189_v1 }
 0x1a5   :  { %970 = vmatprep.subr.mxu0 %v1189_v1  ;;  %1008 = vmatpush3.msra.mxu1 %v586_v51 }
 0x1a6   :  { %971 = vmatpush3.msra.mxu0 %v493_v26  ;;  %1009 = vmatprep.subr.mxu1 %v1189_v1 }
 0x1a7   :  { %972 = vmatprep.subr.mxu0 %v1189_v1  ;;  %1010 = vmatpush3.msra.mxu1 %v585_v52 }
 0x1a8   :  { %973 = vmatpush3.msra.mxu0 %v492_v27  ;;  %1011 = vmatprep.subr.mxu1 %v1189_v1 }
 0x1a9   :  { %974 = vmatprep.subr.mxu0 %v1189_v1  ;;  %1012 = vmatpush3.msra.mxu1 %v584_v53 }
 0x1aa   :  { %975 = vmatpush3.msra.mxu0 %v491_v28 }
 0x1ab   :  { %976 = vmatprep.subr.mxu0 %v1189_v1 }
 0x1ac   :  { %977 = vmatpush3.msra.mxu0 %v490_v29 }
 0x249   :  { %v478_v43 = vpop.f32.mrf.mxu1 }
 0x24b   :  { %v945_v44 = vpop.f32.mrf.mxu1 }
 0x24d   :  { %v408_v46 = vpop.f32.mrf.mxu0 }
 0x24e   :  { %v479_v47 = vadd.f32 %v478_v43, %v408_v46 }
 0x24f   :  { %v910_v48 = vpop.f32.mrf.mxu0 }
 0x250   :  { %v488_v49 = vadd.f32 %v701_v45, %v479_v47 }
 0x252   :  { %v489_v50 = vmax.f32 %v488_v49, 0.0 }
 0x254   :  { %979 = vmatmul.mubr.f32.vlgmr.msra.gmra.mxu0 %v489_v50 }
 0x314   :  { %v579_v55 = vpop.f32.mrf.mxu0 }
 0x315   :  { %v580_v56 = vadd.f32 %v702_v54, %v579_v55 }
 0x316   :  { %v980_v57 = vpop.f32.mrf.mxu0 }
 0x317   :  { %v583_v58 = vmax.f32 %v580_v56, 0.0 }
 0x319   :  { %1014 = vmatmul.mubr.f32.vlgmr.msra.gmra.mxu1 %v583_v58 }
 0x3d9   :  { %v673_v60 = vpop.f32.mrf.mxu1 }
 0x3da   :  { %v674_v61 = vadd.f32 %v703_v59, %v673_v60 }
 0x3db   :  { %v1015_v1 = vpop.f32.mrf.mxu1 }
 0x3dc   :  { %v677_v62 = vmax.f32 %v674_v61, 0.0 }
 0x3de   :  { %678 = vst [vmem:[#allocation13] sm:$0xff] %v677_v62 }
 0x3df   :  { %1161 = shalt.err (!%p1158_p6)
}
 0x3e0   :  { %688 = dma.vmem_to_hbm [thread:$0]  %s686_s13, 128, %s1426_s11, [#allocation4]  }
 0x3e1   :  { %1178 = dma.done.wait [#allocation4], 128  }
 0x3e2   :  { %1179 = vsyncadd [#allocation4], 4294967168 }
 0x3e3   :  { %692 = vsyncpa [#allocation3], 1 }
 0x3e4   :  { %693 = vsyncpa [#allocation6], 1 }
 0x3e5   :  { %694 = vsyncpa [#allocation9], 1 }
 0x3e6   :  { %695 = vsyncpa [#allocation12], 1 }
 0x3e7   :  { %696 = vsyncpa [#allocation4], 1 }

</bundles_post_ra>
